<compile_context>
chip_gen: v5e
topology: v5e:2x2
jax: 0.10.0
libtpu: 0.0.40
codegen_flags: <defaults>
</compile_context>

<pallas_src>
import numpy as np

import jax
import jax.numpy as jnp
from jax import lax
from jax.experimental import pallas as pl
from jax.experimental.pallas import tpu as pltpu


# Classic LBP neighbor order -- only used by make_params to build the module's
# fixed_weights; the kernel itself supports arbitrary (8, 1, 3, 3) filters.
_NEIGHBORS = ((0, 0), (0, 1), (0, 2), (1, 2), (2, 2), (2, 1), (2, 0), (1, 0))


def _classic_lbp_filters():
    w = np.zeros((8, 1, 3, 3), np.float32)
    for k, (dy, dx) in enumerate(_NEIGHBORS):
        w[k, 0, dy, dx] = 1.0
        w[k, 0, 1, 1] = -1.0
    return w


def _lbp_kernel(x_ref, s_ref, b0_ref, w1_ref, b1_ref, w2_ref, b2_ref, out_ref):
    # x_ref:  (NB, F)  flattened images (lane-dense rows)
    # s_ref:  (F, 9)   selection matrix: pointwise-conv weights scattered onto
    #                  the 9 flat positions consumed by the stride-3 3x3 conv
    # b0_ref: (1,)  SMEM   pointwise-conv bias
    # w1_ref: (9, 8) VMEM  block1 fixed 3x3 filters, position-major transpose
    # b1_ref: (1, 8) VMEM  block1 biases
    # w2_ref: (1, 8) VMEM  weighted-sum weights
    # b2_ref: (1,)  SMEM   weighted-sum bias
    xb = x_ref[...]                                                   # (NB, F)

    # intensity_layer (1x1 conv + ReLU), restricted to the 9 consumed positions;
    # the channel reduction is folded into S -> one tiny full-f32 MXU matmul.
    inten = jnp.maximum(
        jnp.dot(xb, s_ref[...],
                preferred_element_type=jnp.float32,
                precision=lax.Precision.HIGHEST)
        + b0_ref[0], 0.0)                                             # (NB, 9)

    # block1: 8 stride-3 3x3 LBP filters on the 1x1 output == (9 -> 8) matmul.
    z1 = jnp.maximum(
        jnp.dot(inten, w1_ref[...],
                preferred_element_type=jnp.float32,
                precision=lax.Precision.HIGHEST)
        + b1_ref[...], 0.0)                                           # (NB, 8)

    # block2: 1x1 weighted sum over the 8 LBP channels + ReLU -> per-image gate.
    z2 = jnp.maximum(
        jnp.sum(z1 * w2_ref[...], axis=1, keepdims=True) + b2_ref[0], 0.0)  # (NB, 1)

    # result = gate * x : one multiply + cast, one dense lane-wide store per row.
    out_ref[...] = (z2 * xb).astype(out_ref.dtype)


def _choose_block_rows(n, f, itemsize):
    """Rows of x per grid step: sublane-aligned, VMEM/step-overhead budgeted."""
    sub = max(8, 32 // itemsize)            # 8 for f32, 16 for bf16, 32 for int8/fp8
    lane_f = pl.cdiv(f, 128) * 128          # lane-padded row width in VMEM
    # ~16 MiB total for the double-buffered x/out blocks (4 buffers): inside the
    # 32 MiB scoped-VMEM default on every generation (incl. v7x, 64 MiB part),
    # so no vmem_limit_bytes override is needed.
    budget = 16 * 1024 * 1024
    nb = min(2048, budget // (4 * lane_f * itemsize))
    nb = max(sub, (nb // sub) * sub)
    n_rounded = pl.cdiv(n, sub) * sub
    if n_rounded <= nb:
        # Whole batch fits in one block.  Split into two grid steps when
        # possible so a v7x chip can shard the "parallel" axis across both
        # TensorCores; neutral on v5e/v6e (single TensorCore).
        if n > sub:
            return max(sub, pl.cdiv(pl.cdiv(n, 2), sub) * sub)
        return n_rounded
    return nb


def lbp_module_forward(x, params):
    """Pallas TPU forward for LBPModule; jit-compatible (no host transfers)."""
    N, C, H, W = x.shape
    if not (3 <= H <= 5 and 3 <= W <= 5):
        raise ValueError(
            "LBPModule's `block2_output * x` only broadcasts when the stride-3 "
            f"3x3 conv output is 1x1, i.e. 3 <= H, W <= 5 (got H={H}, W={W}).")

    F = C * H * W
    HW = H * W
    itemsize = jnp.dtype(x.dtype).itemsize
    NB = _choose_block_rows(N, F, itemsize)
    grid = (pl.cdiv(N, NB),)   # ragged last block is masked by Pallas: no pad/slice

    # Lane-dense flattened view of x (contiguous reshape: free).
    x_flat = x.reshape(N, F)

    # Selection matrix folding the 1x1 pointwise conv + window gather:
    #   S[c*H*W + dy*W + dx, dy*3 + dx] = w0[c]   for dy, dx in [0, 3).
    pos = np.array([dy * W + dx for dy in range(3) for dx in range(3)], np.int64)
    ind = np.zeros((F, 9), np.float32)
    for c in range(C):
        ind[c * HW + pos, np.arange(9)] = 1.0
    w0 = params["w0"].reshape(C).astype(jnp.float32)
    s = jnp.asarray(ind) * jnp.repeat(w0, HW)[:, None]                # (F, 9)

    # Remaining (tiny) parameters; block1's filters as a position-major (9, 8)
    # matrix so arbitrary fixed_weights are handled (no hard-coded LBP check).
    b0 = params["b0"].reshape(1).astype(jnp.float32)
    w1t = jnp.transpose(params["w1"].reshape(8, 9)).astype(jnp.float32)   # (9, 8)
    b1 = params["b1"].reshape(1, 8).astype(jnp.float32)
    w2 = params["w2"].reshape(1, 8).astype(jnp.float32)
    b2 = params["b2"].reshape(1).astype(jnp.float32)

    # Bandwidth-bound: read x once, write gate*x once.
    cost = pl.CostEstimate(
        flops=int(N * (2 * F * 9 + 2 * 9 * 8 + 2 * 8 + 64)),
        transcendentals=0,
        bytes_accessed=int(2 * N * F * itemsize))

    out_flat = pl.pallas_call(
        _lbp_kernel,
        out_shape=jax.ShapeDtypeStruct((N, F), x.dtype),
        grid=grid,
        in_specs=[
            pl.BlockSpec((NB, F), lambda n: (n, 0)),              # x rows
            pl.BlockSpec((F, 9), lambda n: (0, 0)),               # S (grid-invariant)
            pl.BlockSpec(memory_space=pltpu.MemorySpace.SMEM),    # b0
            pl.BlockSpec((9, 8), lambda n: (0, 0)),               # w1^T (grid-invariant)
            pl.BlockSpec((1, 8), lambda n: (0, 0)),               # b1
            pl.BlockSpec((1, 8), lambda n: (0, 0)),               # w2
            pl.BlockSpec(memory_space=pltpu.MemorySpace.SMEM),    # b2
        ],
        out_specs=pl.BlockSpec((NB, F), lambda n: (n, 0)),
        compiler_params=pltpu.CompilerParams(
            dimension_semantics=("parallel",)),
        cost_estimate=cost,
    )(x_flat, s, b0, w1t, b1, w2, b2)

    return out_flat.reshape(N, C, H, W)


def make_params(key, in_channels):
    k0, k1, k2, k3, k4 = jax.random.split(key, 5)
    # pointwise_conv: Conv2d(in_channels, 1, 1)
    w0 = 0.5 * jax.random.normal(k0, (1, in_channels, 1, 1), jnp.float32)
    b0 = 0.1 * jax.random.normal(k1, (1,), jnp.float32)
    # fixed_weights: (8, 1, 3, 3) classic LBP neighbor filters (+1 neighbor, -1 center)
    w1 = jnp.asarray(_classic_lbp_filters())
    b1 = 0.1 * jax.random.normal(k2, (8,), jnp.float32)
    # learnable_weights: Conv2d(8, 1, 1) weight
    w2 = 0.5 * jax.random.normal(k3, (1, 8, 1, 1), jnp.float32)
    b2 = 0.1 * jax.random.normal(k4, (1,), jnp.float32)
    return dict(w0=w0, b0=b0, w1=w1, b1=b1, w2=w2, b2=b2)


def reference_forward(x, p):
    """Pure-JAX (XLA conv) reference reproducing the PyTorch forward."""
    dn = ("NCHW", "OIHW", "NCHW")
    prec = lax.Precision.HIGHEST
    inten = jax.nn.relu(
        lax.conv_general_dilated(x, p["w0"], (1, 1), "VALID",
                                 dimension_numbers=dn, precision=prec)
        + p["b0"][None, :, None, None])
    o1 = jax.nn.relu(
        lax.conv_general_dilated(inten, p["w1"], (3, 3), "VALID",
                                 dimension_numbers=dn, precision=prec)
        + p["b1"][None, :, None, None])
    o2 = jax.nn.relu(
        lax.conv_general_dilated(o1, p["w2"], (1, 1), "VALID",
                                 dimension_numbers=dn, precision=prec)
        + p["b2"][None, :, None, None])
    return o2 * x


if __name__ == "__main__":
    key = jax.random.PRNGKey(0)
    kx1, kx2, kp1, kp2 = jax.random.split(key, 4)

    # Case 1: N divisible by the block rows (2-step parallel grid, NB=32).
    N1, C1, H1, W1 = 64, 4, 5, 5
    x1 = jax.random.normal(kx1, (N1, C1, H1, W1), jnp.float32)
    p1 = make_params(kp1, C1)
    out1 = jax.block_until_ready(lbp_module_forward(x1, p1))
    ref1 = reference_forward(x1, p1)
    assert out1.shape == (N1, C1, H1, W1)
    err1 = float(jnp.max(jnp.abs(out1 - ref1)))
    assert jnp.allclose(out1, ref1, atol=1e-4, rtol=1e-4), err1

    # Case 2: ragged N and non-square spatial (exercises the masked edge block).
    N2, C2, H2, W2 = 13, 3, 4, 3
    x2 = jax.random.normal(kx2, (N2, C2, H2, W2), jnp.float32)
    p2 = make_params(kp2, C2)
    out2 = jax.block_until_ready(lbp_module_forward(x2, p2))
    ref2 = reference_forward(x2, p2)
    assert out2.shape == (N2, C2, H2, W2)
    err2 = float(jnp.max(jnp.abs(out2 - ref2)))
    assert jnp.allclose(out2, ref2, atol=1e-4, rtol=1e-4), err2

    print("KERNEL_OK")
</pallas_src>

<mosaic_0001>
module attributes {stable_mosaic.version = 11 : i64} {
  func.func @_lbp_kernel(%arg0: i32, %arg1: memref<32x100xf32, #tpu.memory_space<vmem>>, %arg2: memref<100x9xf32, #tpu.memory_space<vmem>>, %arg3: memref<1xf32, #tpu.memory_space<smem>>, %arg4: memref<9x8xf32, #tpu.memory_space<vmem>>, %arg5: memref<1x8xf32, #tpu.memory_space<vmem>>, %arg6: memref<1x8xf32, #tpu.memory_space<vmem>>, %arg7: memref<1xf32, #tpu.memory_space<smem>>, %arg8: memref<32x100xf32, #tpu.memory_space<vmem>>) attributes {dimension_semantics = [#tpu.dimension_semantics<parallel>], iteration_bounds = array<i64: 2>, scalar_prefetch = 0 : i64, scratch_operands = 0 : i64, tpu.core_type = #tpu.core_type<tc>, window_params = [{transform_indices = @transform_0, window_bounds = array<i64: 32, 100>}, {pipeline_mode = #tpu.pipeline_mode<synchronous>, transform_indices = @transform_1, window_bounds = array<i64: 100, 9>}, {transform_indices = @transform_2, window_bounds = array<i64: 1>}, {pipeline_mode = #tpu.pipeline_mode<synchronous>, transform_indices = @transform_3, window_bounds = array<i64: 9, 8>}, {pipeline_mode = #tpu.pipeline_mode<synchronous>, transform_indices = @transform_4, window_bounds = array<i64: 1, 8>}, {pipeline_mode = #tpu.pipeline_mode<synchronous>, transform_indices = @transform_5, window_bounds = array<i64: 1, 8>}, {transform_indices = @transform_6, window_bounds = array<i64: 1>}, {transform_indices = @transform_7, window_bounds = array<i64: 32, 100>}]} {
    %c0 = arith.constant 0 : index
    %c0_0 = arith.constant 0 : index
    %0 = vector.load %arg1[%c0, %c0_0] : memref<32x100xf32, #tpu.memory_space<vmem>>, vector<32x100xf32>
    %c0_1 = arith.constant 0 : index
    %c0_2 = arith.constant 0 : index
    %1 = vector.load %arg2[%c0_1, %c0_2] : memref<100x9xf32, #tpu.memory_space<vmem>>, vector<100x9xf32>
    %cst = arith.constant dense<0.000000e+00> : vector<32x9xf32>
    %2 = tpu.matmul %0, %1, %cst {dimension_numbers = #tpu.dot_dimension_numbers<[1], [0], [0], [1], [0, 0, 1, 1], [], []>, precision = #tpu.contract_precision<fp32>} : vector<32x100xf32>, vector<100x9xf32>, vector<32x9xf32> -> vector<32x9xf32>
    %c0_3 = arith.constant 0 : index
    %3 = memref.load %arg3[%c0_3] : memref<1xf32, #tpu.memory_space<smem>>
    %4 = vector.broadcast %3 : f32 to vector<32x9xf32>
    %5 = arith.addf %2, %4 : vector<32x9xf32>
    %cst_4 = arith.constant 0.000000e+00 : f32
    %6 = vector.broadcast %cst_4 : f32 to vector<32x9xf32>
    %7 = arith.maximumf %5, %6 : vector<32x9xf32>
    %c0_5 = arith.constant 0 : index
    %c0_6 = arith.constant 0 : index
    %8 = vector.load %arg4[%c0_5, %c0_6] : memref<9x8xf32, #tpu.memory_space<vmem>>, vector<9x8xf32>
    %cst_7 = arith.constant dense<0.000000e+00> : vector<32x8xf32>
    %9 = tpu.matmul %7, %8, %cst_7 {dimension_numbers = #tpu.dot_dimension_numbers<[1], [0], [0], [1], [0, 0, 1, 1], [], []>, precision = #tpu.contract_precision<fp32>} : vector<32x9xf32>, vector<9x8xf32>, vector<32x8xf32> -> vector<32x8xf32>
    %c0_8 = arith.constant 0 : index
    %c0_9 = arith.constant 0 : index
    %10 = vector.load %arg5[%c0_8, %c0_9] : memref<1x8xf32, #tpu.memory_space<vmem>>, vector<1x8xf32>
    %11 = vector.broadcast %10 : vector<1x8xf32> to vector<32x8xf32>
    %12 = arith.addf %9, %11 : vector<32x8xf32>
    %cst_10 = arith.constant 0.000000e+00 : f32
    %13 = vector.broadcast %cst_10 : f32 to vector<32x8xf32>
    %14 = arith.maximumf %12, %13 : vector<32x8xf32>
    %c0_11 = arith.constant 0 : index
    %c0_12 = arith.constant 0 : index
    %15 = vector.load %arg6[%c0_11, %c0_12] : memref<1x8xf32, #tpu.memory_space<vmem>>, vector<1x8xf32>
    %16 = vector.broadcast %15 : vector<1x8xf32> to vector<32x8xf32>
    %17 = arith.mulf %14, %16 : vector<32x8xf32>
    %cst_13 = arith.constant dense<0.000000e+00> : vector<32xf32>
    %18 = vector.multi_reduction <add>, %17, %cst_13 [1] : vector<32x8xf32> to vector<32xf32>
    %19 = vector.shape_cast %18 : vector<32xf32> to vector<32x1xf32>
    %c0_14 = arith.constant 0 : index
    %20 = memref.load %arg7[%c0_14] : memref<1xf32, #tpu.memory_space<smem>>
    %21 = vector.broadcast %20 : f32 to vector<32x1xf32>
    %22 = arith.addf %19, %21 : vector<32x1xf32>
    %cst_15 = arith.constant 0.000000e+00 : f32
    %23 = vector.broadcast %cst_15 : f32 to vector<32x1xf32>
    %24 = arith.maximumf %22, %23 : vector<32x1xf32>
    %25 = vector.broadcast %24 : vector<32x1xf32> to vector<32x100xf32>
    %26 = arith.mulf %25, %0 : vector<32x100xf32>
    %c0_16 = arith.constant 0 : index
    %c0_17 = arith.constant 0 : index
    %27 = vector.load %arg8[%c0_16, %c0_17] : memref<32x100xf32, #tpu.memory_space<vmem>>, vector<32x100xf32>
    tpu.vector_store %arg8[%c0_16, %c0_17], %26 {strides = array<i32>} : memref<32x100xf32, #tpu.memory_space<vmem>>, vector<32x100xf32>,
    return
  }
  func.func @transform_0(%arg0: i32) -> (i32, i32) {
    %c0_i32 = arith.constant 0 : i32
    %c0_i32_0 = arith.constant 0 : i32
    return %arg0, %c0_i32 : i32, i32
  }
  func.func @transform_1(%arg0: i32) -> (i32, i32) {
    %c0_i32 = arith.constant 0 : i32
    %c0_i32_0 = arith.constant 0 : i32
    %c0_i32_1 = arith.constant 0 : i32
    return %c0_i32, %c0_i32_0 : i32, i32
  }
  func.func @transform_2(%arg0: i32) -> i32 {
    %c0_i32 = arith.constant 0 : i32
    %c0_i32_0 = arith.constant 0 : i32
    return %c0_i32 : i32
  }
  func.func @transform_3(%arg0: i32) -> (i32, i32) {
    %c0_i32 = arith.constant 0 : i32
    %c0_i32_0 = arith.constant 0 : i32
    %c0_i32_1 = arith.constant 0 : i32
    return %c0_i32, %c0_i32_0 : i32, i32
  }
  func.func @transform_4(%arg0: i32) -> (i32, i32) {
    %c0_i32 = arith.constant 0 : i32
    %c0_i32_0 = arith.constant 0 : i32
    %c0_i32_1 = arith.constant 0 : i32
    return %c0_i32, %c0_i32_0 : i32, i32
  }
  func.func @transform_5(%arg0: i32) -> (i32, i32) {
    %c0_i32 = arith.constant 0 : i32
    %c0_i32_0 = arith.constant 0 : i32
    %c0_i32_1 = arith.constant 0 : i32
    return %c0_i32, %c0_i32_0 : i32, i32
  }
  func.func @transform_6(%arg0: i32) -> i32 {
    %c0_i32 = arith.constant 0 : i32
    %c0_i32_0 = arith.constant 0 : i32
    return %c0_i32 : i32
  }
  func.func @transform_7(%arg0: i32) -> (i32, i32) {
    %c0_i32 = arith.constant 0 : i32
    %c0_i32_0 = arith.constant 0 : i32
    return %arg0, %c0_i32 : i32, i32
  }
}

</mosaic_0001>

<bundles_post_ra>
// kernel: tpu_custom_call.1
= control target key start
LH: loop header
LB: loop body
LE: loop exit
PB: predicated region body
PF: predicated region fallthrough
CT: control target
= control target key end

     0   :  { %s1667_s0 = inlined_call_operand.vmem [shape: f32[64,100], index: 0, kind: input, shape index: {}]   ;;  %s1668_s1 = inlined_call_operand.vmem [shape: f32[100,9], index: 1, kind: input, shape index: {}]   ;;  %s1669_s2 = inlined_call_operand.<no memory space> [shape: f32[1], index: 2, kind: input, shape index: {}]   ;;  %s1670_s3 = inlined_call_operand.vmem [shape: f32[9,8], index: 3, kind: input, shape index: {}]   ;;  %s1671_s4 = inlined_call_operand.vmem [shape: f32[1,8], index: 4, kind: input, shape index: {}]   ;;  %s1672_s5 = inlined_call_operand.vmem [shape: f32[1,8], index: 5, kind: input, shape index: {}]   ;;  %s1673_s6 = inlined_call_operand.<no memory space> [shape: f32[1], index: 6, kind: input, shape index: {}]   ;;  %s1674_s7 = inlined_call_operand.hbm [shape: f32[64,100], index: 7, kind: output, shape index: {}]  }
   0x1   :  { %12 = sst [smem:[#allocation2]] %s1669_s2 }
   0x2   :  { %13 = sst [smem:[#allocation3]] %s1673_s6 }
   0x3   :  { %14 = vsyncpa [#allocation5], 0 }
   0x4   :  { %16 = vsyncpa [#allocation5 + $0x1], 0  ;;  %s1281_s28 = smov 0   ;;  %s1283_s29 = smov 0  }
   0x5   :  { %s1285_s30 = smov 0   ;;  %s1287_s8 = smov 0  }
   0x6 LB: > { %s1302_s2 = sadd.s32 4294967295, %s1231_s8   ;;  %s1113_s6 = sadd.s32 4294967294, %s1231_s8   ;;  %s1231_s8 = sphi %s1287_s8, %s1680_s8   ;;  %s1227_s30 = sphi %s1285_s30, %s1679_s30   ;;  %s1223_s29 = sphi %s1283_s29, %s1678_s29   ;;  %s1219_s28 = sphi %s1281_s28, %s1677_s28  }
   0x7   : > { %s1306_s9 = sadd.s32 1, %s1231_s8   ;;  %s181_s10 = sadd.s32 1, %s1227_s30 }
   0x8   : > { %s178_s11 = ssub.s32 %s1231_s8, %s1306_s9  ;;  %p191_p0 = scmp.ne.s32.totalorder %s1227_s30, %s1223_s29 }
   0x9   : > { %p179_p1 = scmp.eq.s32.totalorder %s178_s11, 0  ;;  %p192_p2 = scmp.eq.s32.totalorder %s1302_s2, 1 }
   0xa   : > { %p197_p3 = scmp.ne.s32.totalorder %s1223_s29, %s1219_s28  ;;  %p198_p4 = scmp.eq.s32.totalorder %s1113_s6, 1 }
   0xb   : > { %s1317_s12 = scalar_select %p179_p1, %s1227_s30, %s181_s10  }
   0xc   : > { %p1319_p5 = por %p192_p2, %p191_p0  ;;  %p1323_p6 = por %p198_p4, %p197_p3 }
   0xd   : > { %p1116_p7 = scmp.ge.s32.totalorder %s1231_s8, 1  ;;  %p243_p8 = scmp.lt.s32.totalorder %s1231_s8, 3 }
   0xf   : > { %p244_p9 = pnand %p1116_p7, %p243_p8 }
  0x10   : > { %s1118_s21 = sshll.u32 (!%p244_p9), %s1302_s2, 2  ;;  %s299_s18 = sld [smem:[#allocation2]] (!%p244_p9) }
  0x11   : > { %247 = sbr.rel (%p244_p9) target bundleno = 555 (0x22b), region = 48  ;;  %p276_p10 = scmp.lt.s32.totalorder (!%p244_p9), %s1118_s21, 7 }
  0x12   : > { %s1125_s27 = sshll.u32 (!%p244_p9), %s1302_s2, 5  ;;  %s1189_s22 = scalar_lea.hbm (!%p244_p9), %s1674_s7, 64 }
  0x13   : > { %s1047_s11 = scalar_lea.hbm (!%p244_p9), %s1674_s7, %s1125_s27 }
  0x14   : > { %s1050_s16 = sshll.u32 (!%p244_p9), %s1047_s11, 4  ;;  %s1051_s16 = int_to_ptr.hbm [resolvable:$true] %s1050_s16 }
  0x15   : > { %s1183_s17 = sshra.s32 (!%p244_p9), %s1051_s16, 4  ;;  %s1184_s17 = int_to_ptr.hbm [resolvable:$true] %s1183_s17 }
  0x16   : > { %v298_v0 = vld [vmem:[%s1668_s1 + $0x60] sm:$0xf]  ;;  %vm314_vm0 = vcmask 1043456   ;;  %v297_v1 = vld [vmem:[%s1668_s1 + $0x58] sm:$0xff]  ;;  %v296_v2 = vld [vmem:[%s1668_s1 + $0x50] sm:$0xff]  ;;  %s1682_s21 = smov (!%p276_p10, %s1118_s21), 7  ;;  %p1190_p0 = scmp.lt.s32.totalorder %s1184_s17, %s1674_s7 }
  0x17   : > { %v316_v3 = vsel %vm314_vm0, %v298_v0, 0  ;;  %v1339_v4 = vand.u32 4294901760, %v297_v1  ;;  %v1341_v5 = vand.u32 4294901760, %v296_v2  ;;  %v295_v6 = vld [vmem:[%s1668_s1 + $0x48] sm:$0xff]  ;;  %v294_v7 = vld [vmem:[%s1668_s1 + $0x40] sm:$0xff]  ;;  %v293_v8 = vld [vmem:[%s1668_s1 + $0x38] sm:$0xff] }
  0x18   : > { %v1352_v9 = vand.u32 4294901760, %v316_v3  ;;  %v1354_v10 = vand.u32 4294901760, %v295_v6  ;;  %v1356_v11 = vand.u32 4294901760, %v294_v7  ;;  %v1358_v12 = vand.u32 4294901760, %v293_v8  ;;  %v292_v13 = vld [vmem:[%s1668_s1 + $0x30] sm:$0xff]  ;;  %v291_v17 = vld [vmem:[%s1668_s1 + $0x28] sm:$0xff] }
  0x19   : > { %v1364_v14 = vsub.f32 %v297_v1, %v1339_v4  ;;  %v1367_v15 = vsub.f32 %v296_v2, %v1341_v5  ;;  %v1369_v16 = vand.u32 4294901760, %v292_v13  ;;  %v290_v24 = vld [vmem:[%s1668_s1 + $0x20] sm:$0xff]  ;;  %v1396_v26 = vand.u32 4294901760, %v291_v17  ;;  %v289_v31 = vld [vmem:[%s1668_s1 + $0x18] sm:$0xff]  ;;  %s1119_s20 = sshll.u32 %s1682_s21, 3  ;;  %v288_v37 = vld [vmem:[%s1668_s1 + $0x10] sm:$0xff] }
  0x1a   : > { %322 = vmatpush.msra.mxu0 %v1352_v9  ;;  %v1376_v18 = vsub.f32 %v316_v3, %v1352_v9  ;;  %545 = vmatpush.msra.mxu3 %v1352_v9  ;;  %v1380_v19 = vsub.f32 %v295_v6, %v1354_v10  ;;  %v1383_v20 = vsub.f32 %v294_v7, %v1356_v11  ;;  %v1418_v34 = vand.u32 4294901760, %v290_v24  ;;  %s1423_s24 = scalar_lea.vmem %s1667_s0, %s1119_s20  ;;  %v287_v44 = vld [vmem:[%s1668_s1 + $0x8] sm:$0xff]  ;;  %v286_v51 = vld [vmem:[%s1668_s1] sm:$0xff]  ;;  %s272_s21 = sand.u32 1, %s1223_s29  }
  0x1b   : > { %v391_v21 = vand.u32 4294901760, %v1364_v14  ;;  %v397_v22 = vand.u32 4294901760, %v1367_v15  ;;  %v1388_v23 = vsub.f32 %v293_v8, %v1358_v12  ;;  %v1405_v30 = vsub.f32 %v292_v13, %v1369_v16  ;;  %v1449_v45 = vld [vmem:[%s1423_s24] sm:$0xff]  ;;  %v1466_v52 = vld [vmem:[%s1423_s24 + $0x8] sm:$0xff]  ;;  %v1509_v13 = vld [vmem:[%s1423_s24 + $0x10] sm:$0xff]  ;;  %s1117_s25 = sshll.u32 %s272_s21, 5 }
  0x1c   : > { %324 = vmatpush.msra.mxu0 %v1339_v4  ;;  %483 = vmatpush.msra.mxu2 %v1376_v18  ;;  %v385_v25 = vand.u32 4294901760, %v1376_v18  ;;  %v403_v27 = vand.u32 4294901760, %v1380_v19  ;;  %v409_v29 = vand.u32 4294901760, %v1383_v20  ;;  %v1435_v40 = vand.u32 4294901760, %v289_v31  ;;  %s274_s26 = scalar_lea.vmem [#allocation4], %s1117_s25  ;;  %s1036_s2 = scalar_lea.sflag [#allocation5], %s272_s21 }
  0x1d   : > { %547 = vmatpush.msra.mxu3 %v1339_v4  ;;  %v392_v28 = vsub.f32 %v1364_v14, %v391_v21  ;;  %v398_v33 = vsub.f32 %v1367_v15, %v397_v22  ;;  %v415_v36 = vand.u32 4294901760, %v1388_v23  ;;  %v1438_v41 = vsub.f32 %v291_v17, %v1396_v26  ;;  %s1048_s15 = sshll.u32 %s274_s26, 4  ;;  %s1049_s15 = int_to_ptr.vmem [resolvable:$true] %s1048_s15 }
  0x1e   : > { %326 = vmatpush.msra.mxu0 %v1341_v5  ;;  %486 = vmatpush.msra.mxu2 %v1364_v14  ;;  %v386_v32 = vsub.f32 %v1376_v18, %v385_v25  ;;  %v404_v35 = vsub.f32 %v1380_v19, %v403_v27  ;;  %v410_v42 = vsub.f32 %v1383_v20, %v409_v29  ;;  %v421_v43 = vand.u32 4294901760, %v1405_v30 }
  0x1f   : > { %549 = vmatpush.msra.mxu3 %v1341_v5  ;;  %v393_v39 = vand.u32 4294901760, %v392_v28  ;;  %v399_v46 = vand.u32 4294901760, %v398_v33  ;;  %v1452_v47 = vand.u32 4294901760, %v288_v37  ;;  %v1455_v48 = vsub.f32 %v290_v24, %v1418_v34 }
  0x20   : > { %328 = vmatpush.msra.mxu0 %v1354_v10  ;;  %v387_v38 = vand.u32 4294901760, %v386_v32  ;;  %489 = vmatpush.msra.mxu2 %v1367_v15  ;;  %v405_v49 = vand.u32 4294901760, %v404_v35  ;;  %v416_v50 = vsub.f32 %v1388_v23, %v415_v36  ;;  %vm301_vm1 = vcmask 818176  }
  0x21   : > { %551 = vmatpush.msra.mxu3 %v1354_v10  ;;  %v1469_v53 = vand.u32 4294901760, %v287_v44  ;;  %v427_v54 = vand.u32 4294901760, %v1438_v41  ;;  %v1473_v55 = vsub.f32 %v289_v31, %v1435_v40  ;;  %v303_v56 = vsel %vm301_vm1, %v1449_v45, 0 }
  0x22   : > { %330 = vmatpush.msra.mxu0 %v1356_v11  ;;  %388 = vmatpush.msra.mxu1 %v387_v38  ;;  %v411_v57 = vand.u32 4294901760, %v410_v42  ;;  %v422_v58 = vsub.f32 %v1405_v30, %v421_v43  ;;  %v1482_v59 = vand.u32 4294901760, %v303_v56  ;;  %v1485_v60 = vand.u32 4294901760, %v286_v51 }
  0x23   : > { %492 = vmatpush.msra.mxu2 %v1380_v19  ;;  %553 = vmatpush.msra.mxu3 %v1356_v11  ;;  %v433_v61 = vand.u32 4294901760, %v1455_v48  ;;  %v1489_v62 = vsub.f32 %v288_v37, %v1452_v47  ;;  %v306_v63 = vsel %vm301_vm1, %v1466_v52, 0  ;;  %v417_v2 = vand.u32 4294901760, %v416_v50 }
  0x24   : > { %332 = vmatpush.msra.mxu0 %v1358_v12  ;;  %394 = vmatpush.msra.mxu1 %v393_v39  ;;  %v348_v0 = vsub.f32 %v303_v56, %v1482_v59  ;;  %v1496_v1 = vand.u32 4294901760, %v306_v63  ;;  %v428_v3 = vsub.f32 %v1438_v41, %v427_v54  ;;  %v439_v6 = vand.u32 4294901760, %v1473_v55 }
  0x25   : > { %495 = vmatpush.msra.mxu2 %v1383_v20  ;;  %555 = vmatpush.msra.mxu3 %v1358_v12  ;;  %v1504_v7 = vsub.f32 %v287_v44, %v1469_v53  ;;  %v423_v17 = vand.u32 4294901760, %v422_v58  ;;  %v434_v24 = vsub.f32 %v1455_v48, %v433_v61  ;;  %v445_v28 = vand.u32 4294901760, %v1489_v62  ;;  %v1547_v58 = vld [vmem:[%s1423_s24 + $0x18] sm:$0xff]  ;;  %s1017_s24 = sld [smem:[#allocation3]] }
  0x26   : > { %334 = vmatpush.msra.mxu0 %v1369_v16  ;;  %400 = vmatpush.msra.mxu1 %v399_v46  ;;  %v349_v8 = vand.u32 4294901760, %v348_v0  ;;  %v1517_v31 = vsub.f32 %v286_v51, %v1485_v60  ;;  %v356_v33 = vsub.f32 %v306_v63, %v1496_v1  ;;  %v429_v35 = vand.u32 4294901760, %v428_v3 }
  0x27   : > { %498 = vmatpush.msra.mxu2 %v1388_v23  ;;  %557 = vmatpush.msra.mxu3 %v1369_v16  ;;  %v440_v37 = vsub.f32 %v1473_v55, %v439_v6  ;;  %v451_v38 = vand.u32 4294901760, %v1504_v7  ;;  %v309_v39 = vsel %vm301_vm1, %v1509_v13, 0  ;;  %v435_v42 = vand.u32 4294901760, %v434_v24 }
  0x28   : > { %336 = vmatpush.msra.mxu0 %v1396_v26  ;;  %406 = vmatpush.msra.mxu1 %v405_v49  ;;  %v350_v32 = vsub.f32 %v348_v0, %v349_v8  ;;  %v446_v44 = vsub.f32 %v1489_v62, %v445_v28  ;;  %v457_v46 = vand.u32 4294901760, %v1517_v31  ;;  %v357_v50 = vand.u32 4294901760, %v356_v33 }
  0x29   : > { %501 = vmatpush.msra.mxu2 %v1405_v30  ;;  %559 = vmatpush.msra.mxu3 %v1396_v26  ;;  %v1538_v51 = vand.u32 4294901760, %v309_v39  ;;  %v441_v56 = vand.u32 4294901760, %v440_v37  ;;  %vm736_vm2 = vcmask 1040384   ;;  %vm723_vm3 = vcmask 72704  }
  0x2a   : > { %338 = vmatpush.msra.mxu0 %v1418_v34  ;;  %412 = vmatpush.msra.mxu1 %v411_v57  ;;  %v351_v49 = vand.u32 4294901760, %v350_v32  ;;  %v452_v57 = vsub.f32 %v1504_v7, %v451_v38  ;;  %v447_v63 = vand.u32 4294901760, %v446_v44  ;;  %v358_v3 = vsub.f32 %v356_v33, %v357_v50 }
  0x2b   : > { %504 = vmatpush.msra.mxu2 %v1438_v41  ;;  %561 = vmatpush.msra.mxu3 %v1418_v34  ;;  %v312_v32 = vsel %vm301_vm1, %v1547_v58, 0  ;;  %vm1004_vm4 = vcmask 64512  }
  0x2c   : > { %340 = vmatpush.msra.mxu0 %v1435_v40  ;;  %418 = vmatpush.msra.mxu1 %v417_v2  ;;  %v458_v2 = vsub.f32 %v1517_v31, %v457_v46  ;;  %v453_v24 = vand.u32 4294901760, %v452_v57  ;;  %v359_v37 = vand.u32 4294901760, %v358_v3  ;;  %v371_v44 = vand.u32 4294901760, %v312_v32 }
  0x2d   : > { %507 = vmatpush.msra.mxu2 %v1455_v48  ;;  %563 = vmatpush.msra.mxu3 %v1435_v40 }
  0x2e   : > { %342 = vmatpush.msra.mxu0 %v1452_v47  ;;  %424 = vmatpush.msra.mxu1 %v423_v17  ;;  %v364_v17 = vsub.f32 %v309_v39, %v1538_v51 }
  0x2f   : > { %510 = vmatpush.msra.mxu2 %v1473_v55  ;;  %565 = vmatpush.msra.mxu3 %v1452_v47 }
  0x30   : > { %344 = vmatpush.msra.mxu0 %v1469_v53  ;;  %430 = vmatpush.msra.mxu1 %v429_v35  ;;  %v459_v35 = vand.u32 4294901760, %v458_v2 }
  0x31   : > { %513 = vmatpush.msra.mxu2 %v1489_v62  ;;  %567 = vmatpush.msra.mxu3 %v1469_v53 }
  0x32   : > { %346 = vmatpush.msra.mxu0 %v1485_v60  ;;  %436 = vmatpush.msra.mxu1 %v435_v42  ;;  %v365_v42 = vand.u32 4294901760, %v364_v17 }
  0x33   : > { %352 = vmatmul.f32.vlgmr.msra.gmra.mxu0 %v351_v49  ;;  %516 = vmatpush.msra.mxu2 %v1504_v7  ;;  %v372_v49 = vsub.f32 %v312_v32, %v371_v44 }
  0x34   : > { %442 = vmatpush.msra.mxu1 %v441_v56  ;;  %569 = vmatpush.msra.mxu3 %v1485_v60  ;;  %v366_v39 = vsub.f32 %v364_v17, %v365_v42 }
  0x35   : > { %519 = vmatpush.msra.mxu2 %v1517_v31  ;;  %573 = vmatmul.f32.vlgmr.msra.gmra.mxu3 %v349_v8  ;;  %v373_v18 = vand.u32 4294901760, %v372_v49 }
  0x36   : > { %448 = vmatpush.msra.mxu1 %v447_v63  ;;  %522 = vmatmul.f32.vlgmr.msra.gmra.mxu2 %v348_v0  ;;  %v367_v14 = vand.u32 4294901760, %v366_v39 }
  0x37   : > { %601 = vmatpush.msrb.mxu0 %v385_v25 }
  0x38   : > { %454 = vmatpush.msra.mxu1 %v453_v24 }
  0x39   : > { %605 = vmatpush.msrb.mxu0 %v391_v21  ;;  %v717_v21 = vld [vmem:[%s1670_s3] sm:$0xff] }
  0x3a   : > { %460 = vmatpush.msra.mxu1 %v459_v35 }
  0x3b   : > { %360 = vmatmul.f32.gmra.mxu0 %v359_v37  ;;  %462 = vmatmul.f32.vlgmr.msra.gmra.mxu1 %v1482_v59 }
  0x3c   : > { %671 = vmatpush.msrb.mxu1 %v1352_v9  ;;  %609 = vmatpush.msrb.mxu0 %v397_v22  ;;  %v374_v9 = vsub.f32 %v372_v49, %v373_v18  ;;  %v756_v22 = vand.u32 4294901760, %v717_v21 }
  0x3d   : > { %579 = vmatmul.f32.gmra.mxu3 %v357_v50 }
  0x3e   : > { %673 = vmatpush.msrb.mxu1 %v1339_v4  ;;  %527 = vmatmul.f32.gmra.mxu2 %v356_v33  ;;  %v375_v4 = vand.u32 4294901760, %v374_v9  ;;  %v812_v23 = vsub.f32 %v717_v21, %v756_v22 }
  0x3f   : > { %613 = vmatpush.msrb.mxu0 %v403_v27 }
  0x40   : > { %675 = vmatpush.msrb.mxu1 %v1341_v5  ;;  %v718_v5 = vld [vmem:[%s1670_s3 + $0x8] sm:$0x1]  ;;  %v813_v27 = vand.u32 4294901760, %v812_v23 }
  0x41   : > { %617 = vmatpush.msrb.mxu0 %v409_v29 }
  0x42   : > { %677 = vmatpush.msrb.mxu1 %v1354_v10  ;;  %v738_v10 = vsel %vm736_vm2, %v718_v5, 0  ;;  %v814_v29 = vsub.f32 %v812_v23, %v813_v27 }
  0x43   : > { %368 = vmatmul.f32.gmra.mxu0 %v367_v14  ;;  %466 = vmatmul.f32.gmra.mxu1 %v1496_v1 }
  0x44   : > { %621 = vmatpush.msrb.mxu0 %v415_v36  ;;  %679 = vmatpush.msrb.mxu1 %v1356_v11  ;;  %v754_v11 = vand.u32 4294901760, %v738_v10  ;;  %v815_v30 = vand.u32 4294901760, %v814_v29 }
  0x45   : > { %585 = vmatmul.f32.gmra.mxu3 %v365_v42 }
  0x46   : > { %625 = vmatpush.msrb.mxu0 %v421_v43  ;;  %532 = vmatmul.f32.gmra.mxu2 %v364_v17 }
  0x47   : > { %681 = vmatpush.msrb.mxu1 %v1358_v12  ;;  %755 = vmatpush.msrb.mxu2 %v754_v11  ;;  %v806_v12 = vsub.f32 %v738_v10, %v754_v11 }
  0x48   : > { %629 = vmatpush.msrb.mxu0 %v427_v54 }
  0x49   : > { %683 = vmatpush.msrb.mxu1 %v1369_v16  ;;  %v807_v15 = vand.u32 4294901760, %v806_v12  ;;  %757 = vmatpush.msrb.mxu2 %v756_v22 }
  0x4a   : > { %633 = vmatpush.msrb.mxu0 %v433_v61 }
  0x4b   : > { %376 = vmatmul.f32.gmra.mxu0 %v375_v4  ;;  %470 = vmatmul.f32.gmra.mxu1 %v1538_v51  ;;  %v808_v19 = vsub.f32 %v806_v12, %v807_v15 }
  0x4c   : > { %637 = vmatpush.msrb.mxu0 %v439_v6  ;;  %685 = vmatpush.msrb.mxu1 %v1396_v26 }
  0x4d   : > { %591 = vmatmul.f32.gmra.mxu3 %v373_v18  ;;  %v809_v20 = vand.u32 4294901760, %v808_v19  ;;  %935 = vmatpush.msra.mxu2 %v807_v15 }
  0x4e   : > { %641 = vmatpush.msrb.mxu0 %v445_v28  ;;  %537 = vmatmul.f32.gmra.mxu2 %v372_v49 }
  0x4f   : > { %687 = vmatpush.msrb.mxu1 %v1418_v34  ;;  %810 = vmatpush.msrb.mxu3 %v809_v20 }
  0x50   : > { %645 = vmatpush.msrb.mxu0 %v451_v38  ;;  %939 = vmatpush.msra.mxu2 %v813_v27 }
  0x51   : > { %689 = vmatpush.msrb.mxu1 %v1435_v40  ;;  %816 = vmatpush.msrb.mxu3 %v815_v30  ;;  %v300_v40 = vstv %s299_s18  ;;  %s1185_s18 = scalar_lea.hbm %s1184_s17, 32 }
  0x52   : > { %649 = vmatpush.msrb.mxu0 %v457_v46  ;;  %p1186_p11 = scmp.ne.s32.totalorder %s1184_s17, %s1185_s18  ;;  %p1191_p1 = scmp.lt.s32.totalorder %s1189_s22, %s1185_s18 }
  0x53   : > { %474 = vmatmul.f32.gmra.mxu1 %v371_v44  ;;  %651 = vmatmul.f32.vlgmr.msrb.gmra.mxu0 %v1482_v59 }
  0x54   : > { %691 = vmatpush.msrb.mxu1 %v1452_v47  ;;  %850 = vmatpush.msra.mxu0 %v806_v12  ;;  %p1187_p12 = pnand %p1186_p11, %p1319_p5  ;;  %p1192_p2 = por %p1191_p1, %p1190_p0 }
  0x55   : > { %972 = vmatpush.msra.mxu3 %v754_v11 }
  0x56   : > { %693 = vmatpush.msrb.mxu1 %v1469_v53  ;;  %853 = vmatpush.msra.mxu0 %v812_v23  ;;  %p1188_p13 = pneg %p1187_p12 }
  0x57   : > { %974 = vmatpush.msra.mxu3 %v756_v22 }
  0x58   : > { %695 = vmatpush.msrb.mxu1 %v1485_v60  ;;  %p1193_p3 = pnand %p1192_p2, %p1188_p13 }
  0x5a   : > { %890 = vmatpush.msra.mxu1 %v754_v11 }
  0x5b   : > { %655 = vmatmul.f32.gmra.mxu0 %v1496_v1  ;;  %697 = vmatmul.f32.vlgmr.msrb.gmra.mxu1 %v1482_v59 }
  0x5c   : > { %892 = vmatpush.msra.mxu1 %v756_v22 }
  0x63   : > { %659 = vmatmul.f32.gmra.mxu0 %v1538_v51  ;;  %701 = vmatmul.f32.gmra.mxu1 %v1496_v1 }
  0x6b   : > { %663 = vmatmul.f32.gmra.mxu0 %v371_v44  ;;  %705 = vmatmul.f32.gmra.mxu1 %v1538_v51 }
  0x73   : > { %709 = vmatmul.f32.gmra.mxu1 %v371_v44 }
  0xb0   : > { %v353_v16 = vpop.f32.mrf.mxu0 }
  0xb1   : > { %v354_v48 = vadd.f32 %v353_v16, %v300_v40 }
  0xb8   : > { %v361_v25 = vpop.f32.mrf.mxu0  ;;  %v463_v26 = vpop.f32.mrf.mxu1 }
  0xb9   : > { %v523_v41 = vpop.f32.mrf.mxu2  ;;  %v574_v53 = vpop.f32.mrf.mxu3  ;;  %v464_v54 = vadd.f32 %v463_v26, %v354_v48  ;;  %v362_v60 = vadd.f32 %v361_v25, %v300_v40 }
  0xbb   : > { %v524_v61 = vadd.f32 %v523_v41, %v464_v54 }
  0xbd   : > { %v575_v0 = vadd.f32 %v574_v53, %v524_v61 }
  0xc0   : > { %v369_v34 = vpop.f32.mrf.mxu0  ;;  %v467_v36 = vpop.f32.mrf.mxu1 }
  0xc1   : > { %v528_v62 = vpop.f32.mrf.mxu2  ;;  %v468_v1 = vadd.f32 %v467_v36, %v362_v60  ;;  %v580_v6 = vpop.f32.mrf.mxu3  ;;  %v370_v31 = vadd.f32 %v369_v34, %v300_v40 }
  0xc3   : > { %v529_v33 = vadd.f32 %v528_v62, %v468_v1 }
  0xc5   : > { %v581_v51 = vadd.f32 %v580_v6, %v529_v33 }
  0xc8   : > { %v377_v43 = vpop.f32.mrf.mxu0  ;;  %v471_v47 = vpop.f32.mrf.mxu1 }
  0xc9   : > { %v533_v50 = vpop.f32.mrf.mxu2  ;;  %v472_v56 = vadd.f32 %v471_v47, %v370_v31  ;;  %v586_v3 = vpop.f32.mrf.mxu3  ;;  %v378_v32 = vadd.f32 %v377_v43, %v300_v40 }
  0xcb   : > { %v534_v35 = vadd.f32 %v533_v50, %v472_v56 }
  0xcd   : > { %v587_v14 = vadd.f32 %v586_v3, %v534_v35 }
  0xd0   : > { %v475_v55 = vpop.f32.mrf.mxu1  ;;  %v652_v59 = vpop.f32.mrf.mxu0 }
  0xd1   : > { %v653_v7 = vadd.f32 %v652_v59, %v575_v0  ;;  %v476_v18 = vadd.f32 %v475_v55, %v378_v32  ;;  %v538_v4 = vpop.f32.mrf.mxu2  ;;  %v592_v20 = vpop.f32.mrf.mxu3 }
  0xd3   : > { %v539_v16 = vadd.f32 %v538_v4, %v476_v18 }
  0xd5   : > { %v593_v26 = vadd.f32 %v592_v20, %v539_v16 }
  0xd8   : > { %v656_v8 = vpop.f32.mrf.mxu0  ;;  %v698_v28 = vpop.f32.mrf.mxu1 }
  0xd9   : > { %v699_v38 = vadd.f32 %v698_v28, %v653_v7  ;;  %v657_v2 = vadd.f32 %v656_v8, %v581_v51  ;;  %v1167_v28 = vld [vmem:[%s1671_s4] ss:$0 sm:$0xff] }
  0xdb   : > { %v713_v46 = vmax.f32 %v699_v38, 0.0 }
  0xdd   : > { %v725_v57 = vsel %vm723_vm3, %v713_v46, 0 }
  0xde   : > { %v758_v63 = vand.u32 4294901760, %v725_v57 }
  0xe0   : > { %v759_v17 = vsub.f32 %v725_v57, %v758_v63  ;;  %v702_v24 = vpop.f32.mrf.mxu1  ;;  %818 = vmatmul.f32.vlgmr.msrb.gmra.mxu3 %v758_v63  ;;  %v660_v42 = vpop.f32.mrf.mxu0 }
  0xe1   : > { %v703_v37 = vadd.f32 %v702_v24, %v657_v2  ;;  %v661_v11 = vadd.f32 %v660_v42, %v587_v14 }
  0xe2   : > { %856 = vmatmul.f32.vlgmr.msra.gmra.mxu0 %v759_v17  ;;  %v760_v44 = vand.u32 4294901760, %v759_v17 }
  0xe3   : > { %v714_v39 = vmax.f32 %v703_v37, 0.0 }
  0xe4   : > { %896 = vmatmul.f32.vlgmr.msra.gmra.mxu1 %v760_v44  ;;  %v761_v49 = vsub.f32 %v759_v17, %v760_v44 }
  0xe5   : > { %v728_v9 = vsel %vm723_vm3, %v714_v39, 0 }
  0xe6   : > { %v766_v5 = vand.u32 4294901760, %v728_v9  ;;  %v762_v10 = vand.u32 4294901760, %v761_v49  ;;  %v1168_v49 = vld [vmem:[%s1672_s5] ss:$0 sm:$0xff] }
  0xe8   : > { %v706_v12 = vpop.f32.mrf.mxu1  ;;  %763 = vmatmul.f32.vlgmr.msrb.gmra.mxu2 %v762_v10  ;;  %822 = vmatmul.f32.gmra.mxu3 %v766_v5  ;;  %v767_v15 = vsub.f32 %v728_v9, %v766_v5  ;;  %v664_v23 = vpop.f32.mrf.mxu0 }
  0xe9   : > { %v707_v19 = vadd.f32 %v706_v12, %v661_v11  ;;  %v665_v34 = vadd.f32 %v664_v23, %v593_v26 }
  0xea   : > { %861 = vmatmul.f32.gmra.mxu0 %v767_v15  ;;  %v768_v21 = vand.u32 4294901760, %v767_v15 }
  0xeb   : > { %v715_v22 = vmax.f32 %v707_v19, 0.0 }
  0xec   : > { %902 = vmatmul.f32.gmra.mxu1 %v768_v21  ;;  %v769_v25 = vsub.f32 %v767_v15, %v768_v21 }
  0xed   : > { %v731_v27 = vsel %vm723_vm3, %v715_v22, 0 }
  0xee   : > { %v774_v29 = vand.u32 4294901760, %v731_v27  ;;  %v770_v30 = vand.u32 4294901760, %v769_v25 }
  0xf0   : > { %v710_v36 = vpop.f32.mrf.mxu1  ;;  %771 = vmatmul.f32.gmra.mxu2 %v770_v30  ;;  %826 = vmatmul.f32.gmra.mxu3 %v774_v29  ;;  %v775_v40 = vsub.f32 %v731_v27, %v774_v29 }
  0xf1   : > { %v711_v41 = vadd.f32 %v710_v36, %v665_v34 }
  0xf2   : > { %866 = vmatmul.f32.gmra.mxu0 %v775_v40  ;;  %v776_v43 = vand.u32 4294901760, %v775_v40 }
  0xf3   : > { %v716_v47 = vmax.f32 %v711_v41, 0.0 }
  0xf4   : > { %908 = vmatmul.f32.gmra.mxu1 %v776_v43  ;;  %v777_v48 = vsub.f32 %v775_v40, %v776_v43 }
  0xf5   : > { %v734_v53 = vsel %vm723_vm3, %v716_v47, 0 }
  0xf6   : > { %v782_v54 = vand.u32 4294901760, %v734_v53  ;;  %v778_v55 = vand.u32 4294901760, %v777_v48 }
  0xf8   : > { %779 = vmatmul.f32.gmra.mxu2 %v778_v55  ;;  %830 = vmatmul.f32.gmra.mxu3 %v782_v54  ;;  %v783_v59 = vsub.f32 %v734_v53, %v782_v54 }
  0xfa   : > { %871 = vmatmul.f32.gmra.mxu0 %v783_v59  ;;  %v784_v60 = vand.u32 4294901760, %v783_v59 }
  0xfc   : > { %914 = vmatmul.f32.gmra.mxu1 %v784_v60  ;;  %v785_v61 = vsub.f32 %v783_v59, %v784_v60 }
  0xfe   : > { %v786_v62 = vand.u32 4294901760, %v785_v61 }
 0x100   : > { %787 = vmatmul.f32.gmra.mxu2 %v786_v62  ;;  %976 = vmatmul.f32.vlgmr.msra.gmra.mxu3 %v758_v63 }
 0x108   : > { %941 = vmatmul.f32.vlgmr.msra.gmra.mxu2 %v758_v63  ;;  %980 = vmatmul.f32.gmra.mxu3 %v766_v5 }
 0x110   : > { %945 = vmatmul.f32.gmra.mxu2 %v766_v5  ;;  %984 = vmatmul.f32.gmra.mxu3 %v774_v29 }
 0x118   : > { %949 = vmatmul.f32.gmra.mxu2 %v774_v29  ;;  %988 = vmatmul.f32.gmra.mxu3 %v782_v54 }
 0x120   : > { %953 = vmatmul.f32.gmra.mxu2 %v782_v54 }
 0x15f   : > { %v857_v46 = vpop.f32.mrf.mxu0 }
 0x161   : > { %v897_v51 = vpop.f32.mrf.mxu1 }
 0x163   : > { %v819_v0 = vpop.f32.mrf.mxu3 }
 0x167   : > { %v862_v3 = vpop.f32.mrf.mxu0 }
 0x169   : > { %v903_v37 = vpop.f32.mrf.mxu1 }
 0x16b   : > { %v764_v1 = vpop.f32.mrf.mxu2  ;;  %v823_v6 = vpop.f32.mrf.mxu3 }
 0x16c   : > { %v765_v38 = vadd.f32 %v1167_v28, %v764_v1 }
 0x16e   : > { %v820_v50 = vadd.f32 %v819_v0, %v765_v38 }
 0x16f   : > { %v867_v10 = vpop.f32.mrf.mxu0 }
 0x170   : > { %v858_v63 = vadd.f32 %v857_v46, %v820_v50 }
 0x171   : > { %v909_v21 = vpop.f32.mrf.mxu1 }
 0x172   : > { %v898_v24 = vadd.f32 %v897_v51, %v858_v63 }
 0x173   : > { %v772_v7 = vpop.f32.mrf.mxu2  ;;  %v827_v8 = vpop.f32.mrf.mxu3 }
 0x174   : > { %v773_v57 = vadd.f32 %v1167_v28, %v772_v7 }
 0x176   : > { %v824_v17 = vadd.f32 %v823_v6, %v773_v57  ;;  %v1018_v6 = vstv %s1017_s24 }
 0x177   : > { %v872_v36 = vpop.f32.mrf.mxu0 }
 0x178   : > { %v863_v39 = vadd.f32 %v862_v3, %v824_v17 }
 0x179   : > { %v915_v47 = vpop.f32.mrf.mxu1 }
 0x17a   : > { %v904_v4 = vadd.f32 %v903_v37, %v863_v39 }
 0x17b   : > { %v780_v31 = vpop.f32.mrf.mxu2  ;;  %v831_v33 = vpop.f32.mrf.mxu3 }
 0x17c   : > { %v781_v42 = vadd.f32 %v1167_v28, %v780_v31 }
 0x17e   : > { %v828_v9 = vadd.f32 %v827_v8, %v781_v42 }
 0x180   : > { %v868_v20 = vadd.f32 %v867_v10, %v828_v9 }
 0x182   : > { %v910_v25 = vadd.f32 %v909_v21, %v868_v20 }
 0x183   : > { %v788_v56 = vpop.f32.mrf.mxu2  ;;  %v977_v2 = vpop.f32.mrf.mxu3 }
 0x184   : > { %v789_v16 = vadd.f32 %v1167_v28, %v788_v56 }
 0x186   : > { %v832_v23 = vadd.f32 %v831_v33, %v789_v16 }
 0x188   : > { %v873_v41 = vadd.f32 %v872_v36, %v832_v23 }
 0x18a   : > { %v916_v48 = vadd.f32 %v915_v47, %v873_v41 }
 0x18b   : > { %v942_v32 = vpop.f32.mrf.mxu2  ;;  %v981_v18 = vpop.f32.mrf.mxu3 }
 0x18c   : > { %v943_v35 = vadd.f32 %v942_v32, %v898_v24 }
 0x18e   : > { %v978_v44 = vadd.f32 %v977_v2, %v943_v35 }
 0x190   : > { %v992_v14 = vmax.f32 %v978_v44, 0.0 }
 0x192   : > { %v1000_v5 = vmul.f32 %v1168_v49, %v992_v14 }
 0x193   : > { %v946_v11 = vpop.f32.mrf.mxu2  ;;  %v985_v27 = vpop.f32.mrf.mxu3 }
 0x194   : > { %v947_v12 = vadd.f32 %v946_v11, %v904_v4  ;;  %v1005_v15 = vsel %vm1004_vm4, %v1000_v5, 0.0 }
 0x195   : > { %1006 = vadd.xlane.f32.xlu0 %v1005_v15 }
 0x196   : > { %v982_v19 = vadd.f32 %v981_v18, %v947_v12 }
 0x198   : > { %v993_v22 = vmax.f32 %v982_v19, 0.0 }
 0x19a   : > { %v1001_v26 = vmul.f32 %v1168_v49, %v993_v22 }
 0x19b   : > { %v950_v29 = vpop.f32.mrf.mxu2  ;;  %v989_v60 = vpop.f32.mrf.mxu3 }
 0x19c   : > { %v951_v30 = vadd.f32 %v950_v29, %v910_v25  ;;  %v1008_v34 = vsel %vm1004_vm4, %v1001_v26, 0.0 }
 0x19d   : > { %1009 = vadd.xlane.f32.xlu0 %v1008_v34 }
 0x19e   : > { %v986_v40 = vadd.f32 %v985_v27, %v951_v30 }
 0x1a0   : > { %v994_v43 = vmax.f32 %v986_v40, 0.0 }
 0x1a2   : > { %v1002_v53 = vmul.f32 %v1168_v49, %v994_v43 }
 0x1a3   : > { %v954_v54 = vpop.f32.mrf.mxu2 }
 0x1a4   : > { %v955_v55 = vadd.f32 %v954_v54, %v916_v48  ;;  %v1011_v59 = vsel %vm1004_vm4, %v1002_v53, 0.0 }
 0x1a5   : > { %1012 = vadd.xlane.f32.xlu1 %v1011_v59 }
 0x1a6   : > { %v990_v61 = vadd.f32 %v989_v60, %v955_v55 }
 0x1a8   : > { %v995_v62 = vmax.f32 %v990_v61, 0.0 }
 0x1aa   : > { %v1003_v0 = vmul.f32 %v1168_v49, %v995_v62 }
 0x1ac   : > { %v1014_v1 = vsel %vm1004_vm4, %v1003_v0, 0.0 }
 0x1ad   : > { %1015 = vadd.xlane.f32.xlu1 %v1014_v1 }
 0x208   : > { %v1007_v7 = vpop.xlane.xlu0 %1006 }
 0x209   : > { %v1019_v8 = vadd.f32 %v1018_v6, %v1007_v7 }
 0x20b   : > { %v1023_v28 = vmax.f32 %v1019_v8, 0.0 }
 0x20d   : > { %v1027_v31 = vmul.f32 %v1023_v28, %v1449_v45 }
 0x20f   : > { %1031 = vst.msk [vmem:[%s274_s26] sm:$0xff] %vm301_vm1, %v1027_v31 }
 0x210   : > { %v1010_v33 = vpop.xlane.xlu0 %1009 }
 0x211   : > { %v1020_v38 = vadd.f32 %v1018_v6, %v1010_v33 }
 0x213   : > { %v1024_v46 = vmax.f32 %v1020_v38, 0.0 }
 0x215   : > { %v1028_v50 = vmul.f32 %v1024_v46, %v1466_v52 }
 0x217   : > { %1032 = vst.msk [vmem:[%s274_s26 + $0x8] sm:$0xff] %vm301_vm1, %v1028_v50 }
 0x218   : > { %v1013_v51 = vpop.xlane.xlu1 %1012 }
 0x219   : > { %v1021_v56 = vadd.f32 %v1018_v6, %v1013_v51 }
 0x21b   : > { %v1025_v57 = vmax.f32 %v1021_v56, 0.0 }
 0x21d   : > { %v1029_v63 = vmul.f32 %v1025_v57, %v1509_v13 }
 0x21f   : > { %1033 = vst.msk [vmem:[%s274_s26 + $0x10] sm:$0xff] %vm301_vm1, %v1029_v63 }
 0x220   : > { %v1016_v45 = vpop.xlane.xlu1 %1015 }
 0x221   : > { %v1022_v2 = vadd.f32 %v1018_v6, %v1016_v45 }
 0x223   : > { %v1026_v52 = vmax.f32 %v1022_v2, 0.0 }
 0x225   : > { %v1030_v3 = vmul.f32 %v1026_v52, %v1547_v58 }
 0x227   : > { %1034 = vst.msk [vmem:[%s274_s26 + $0x18] sm:$0xff] %vm301_vm1, %v1030_v3 }
 0x228   : > { %1196 = shalt.err (!%p1193_p3)
}
 0x229   : > { %s1233_s21 = smov 128   ;;  %s1234_s25 = smov 8  }
 0x22a   : > { %1126 = dma.vmem_to_hbm [thread:$0]  (%p1319_p5), %s1049_s15, 512, %s1051_s16, %s1036_s2, %s1233_s21, %s1233_s21, %s1234_s25  }
 0x22b PF: > { %p1132_p4 = scmp.ge.s32.totalorder %s1231_s8, 2  ;;  %s1065_s26 = sand.u32 1, %s1219_s28  }
 0x22c   : > { %s1066_s27 = scalar_lea.sflag [#allocation5], %s1065_s26 }
 0x22d   : > { %p1129_p7 = pnand %p1132_p4, %p1323_p6 }
 0x22f   : > { %p1130_p8 = pneg %p1129_p7 }
 0x231   : > { %1214 = dma.done.wait (%p1130_p8), %s1066_s27, 512  }
 0x232   : > { %1216 = vsyncadd (%p1130_p8), %s1066_s27, 4294966784  ;;  %p19_p9 = scmp.ge.s32.totalorder %s1306_s9, 4   ;;  %s1677_s28 = smov %s1223_s29 }
 0x233   : > { %s1678_s29 = smov %s1227_s30  ;;  %s1679_s30 = smov %s1317_s12 }
 0x234   : > { %s1680_s8 = smov %s1306_s9  ;;  %21 = sbr.rel (!%p19_p9) target bundleno = 6 (0x6), region = 83 }
 0x239   :  { %1072 = vsyncpa [#allocation5], 1 }
 0x23a   :  { %1074 = vsyncpa [#allocation5 + $0x1], 1 }

</bundles_post_ra>
